<compile_context>
chip_gen: v5e
topology: v5e:2x2
jax: 0.10.0
libtpu: 0.0.40
codegen_flags: <defaults>
</compile_context>

<pallas_src>
import math

import jax
import jax.numpy as jnp
from jax import lax
from jax.experimental import pallas as pl
from jax.experimental.pallas import tpu as pltpu

_LANE = 128   # lane width
_OPAD = 8     # output channels (2) padded to one sublane group


def _round_up(a: int, b: int) -> int:
    return ((a + b - 1) // b) * b


def _mlp_kernel(x_ref, w1_ref, b1_ref, w2t_ref, b2t_ref, ot_ref):
    # Layer 1: (TM, Din) @ (Din, Hp) -> (TM, Hp), + bias, tanh (f32 on EUP/VPU).
    x = x_ref[...]
    h = jnp.dot(x, w1_ref[...], preferred_element_type=jnp.float32)
    h = jnp.tanh(h + b1_ref[...])                      # (TM, Hp) + (1, Hp)
    # Layer 2 directly in transposed form (contract last dims of both operands,
    # same MXU pattern as q @ k^T):  y_t[o, m] = sum_k w2t[o, k] * h[m, k].
    # NOTE: astype is a no-op for f32 params; with bf16 params it would feed
    # the MXU in bf16 (intentional for MXU efficiency, slight f32 divergence).
    y_t = lax.dot_general(
        w2t_ref[...], h.astype(w2t_ref.dtype),
        dimension_numbers=(((1,), (1,)), ((), ())),
        preferred_element_type=jnp.float32)            # (OPAD, TM)
    y_t = y_t + b2t_ref[...]                           # + (OPAD, 1), lane bcast
    ot_ref[...] = y_t.astype(ot_ref.dtype)             # lane-dense store


def prepare_ontop_params(w1, b1, w2, b2):
    """One-time padding / layout of the Linear params (hoisted out of forward).

    w1: (input_size, hidden)   [= torch linear1.weight.T]
    b1: (hidden,)
    w2: (hidden, 2)            [= torch linear2.weight.T]
    b2: (2,)
    """
    d_in, hidden = w1.shape
    out_dim = w2.shape[1]
    h_pad = _round_up(max(hidden, _LANE), _LANE)
    return dict(
        w1p=jnp.pad(w1, ((0, 0), (0, h_pad - hidden))),                   # (Din, Hp)
        b1p=jnp.pad(b1, (0, h_pad - hidden)).reshape(1, h_pad),           # (1, Hp)
        w2t=jnp.pad(w2.T, ((0, _OPAD - out_dim), (0, h_pad - hidden))),   # (OPAD, Hp)
        b2t=jnp.pad(b2, (0, _OPAD - out_dim)).reshape(_OPAD, 1),          # (OPAD, 1)
        d_in=d_in, h_pad=h_pad, out_dim=out_dim,
    )


def _choose_row_tile(n: int, tm: int):
    # Small problems: one full-array tile (no row padding at all).
    if n <= 1024 and n <= tm:
        return n, 1
    # Otherwise: 128-multiple tile (lane-dense transposed stores), capped so
    # grid >= 2 (lets the row axis split across both v7x TensorCores; the one
    # extra grid step is noise on single-TC v5e/v6e).
    half = _round_up(-(-n // 2), _LANE)
    tm_eff = max(_LANE, min(_round_up(min(tm, n), _LANE), half))
    return tm_eff, pl.cdiv(n, tm_eff)


def ontop_modeler_forward(x, params, *, tm=4096):
    """x: (..., input_size) -> (..., 2).  `params` from prepare_ontop_params."""
    orig_shape = x.shape
    d_in, h_pad, out_dim = params["d_in"], params["h_pad"], params["out_dim"]
    assert orig_shape[-1] == d_in
    n = math.prod(orig_shape[:-1])
    x2 = x.reshape(n, d_in)

    tm_eff, grid_n = _choose_row_tile(n, tm)

    # Explicit VMEM budget: double-buffered x / transposed-out tiles, resident
    # params, and layer-1 activation temporaries; clamp inside every
    # generation's scoped-VMEM default (16 MiB v5e, 32 MiB v6e/v7x).
    est = (2 * tm_eff * d_in * 4
           + 2 * _OPAD * tm_eff * 4
           + 2 * (d_in * h_pad + h_pad + _OPAD * h_pad + _OPAD) * 4
           + 3 * tm_eff * h_pad * 4)
    vmem_limit = int(min(max(2 * est, 16 << 20), 32 << 20))

    out_t = pl.pallas_call(
        _mlp_kernel,
        out_shape=jax.ShapeDtypeStruct((_OPAD, n), x.dtype),
        grid_spec=pltpu.PrefetchScalarGridSpec(
            num_scalar_prefetch=0,
            grid=(grid_n,),
            in_specs=[
                pl.BlockSpec((tm_eff, d_in), lambda i: (i, 0)),    # x row tile
                pl.BlockSpec((d_in, h_pad), lambda i: (0, 0)),     # w1 resident
                pl.BlockSpec((1, h_pad), lambda i: (0, 0)),        # b1 resident
                pl.BlockSpec((_OPAD, h_pad), lambda i: (0, 0)),    # w2^T resident
                pl.BlockSpec((_OPAD, 1), lambda i: (0, 0)),        # b2 resident
            ],
            out_specs=pl.BlockSpec((_OPAD, tm_eff), lambda i: (0, i)),
        ),
        compiler_params=pltpu.CompilerParams(
            # TODO(synk): on v7x builds, pltpu.CORE_PARALLEL on the row axis
            # guarantees the 2-TC split; plain "parallel" kept for portability.
            dimension_semantics=("parallel",),
            vmem_limit_bytes=vmem_limit),
    )(x2, params["w1p"], params["b1p"], params["w2t"], params["b2t"])

    # Tiny slice + transpose of the (2, n) useful sub-array back to (..., 2).
    return out_t[:out_dim, :].T.reshape(orig_shape[:-1] + (out_dim,))


if __name__ == "__main__":
    # Small, deterministic setup consistent with the module:
    # input_size=32, hidden_nodes=16, batch=2, seq=8 -> x: (2, 8, 32)
    input_size = 32
    hidden_nodes = 16
    batch, seq = 2, 8

    key = jax.random.PRNGKey(0)
    kx, kw1, kb1, kw2, kb2, kxb = jax.random.split(key, 6)

    x = jax.random.normal(kx, (batch, seq, input_size), dtype=jnp.float32)

    # nn.Linear weight is (out, in); we build (in, out) directly (i.e. W^T).
    w1 = jax.random.normal(kw1, (input_size, hidden_nodes), dtype=jnp.float32) * 0.1
    b1 = jax.random.normal(kb1, (hidden_nodes,), dtype=jnp.float32) * 0.1
    w2 = jax.random.normal(kw2, (hidden_nodes, 2), dtype=jnp.float32) * 0.1
    b2 = jax.random.normal(kb2, (2,), dtype=jnp.float32) * 0.1

    # One-time parameter padding / layout (hoisted out of the per-call path).
    params = prepare_ontop_params(w1, b1, w2, b2)

    # Pure-JAX reference of the forward semantics.
    def ref_fn(xs):
        return jnp.tanh(xs @ w1 + b1) @ w2 + b2

    # 1) Module-sized input (batch=2, seq=8) -> single-tile path.
    y = ontop_modeler_forward(x, params)
    jax.block_until_ready(y)
    assert y.shape == (batch, seq, 2)
    assert jnp.allclose(y, ref_fn(x), atol=1e-5, rtol=1e-5)

    # 2) Ragged row count -> multi-step grid with a clipped final partial block.
    x_big = jax.random.normal(kxb, (3000, input_size), dtype=jnp.float32)
    y_big = ontop_modeler_forward(x_big, params, tm=1024)
    jax.block_until_ready(y_big)
    assert y_big.shape == (3000, 2)
    assert jnp.allclose(y_big, ref_fn(x_big), atol=1e-5, rtol=1e-5)

    print("KERNEL_OK")
</pallas_src>

<mosaic_0001>
module attributes {stable_mosaic.version = 11 : i64} {
  func.func @_mlp_kernel(%arg0: i32, %arg1: memref<16x32xf32, #tpu.memory_space<vmem>>, %arg2: memref<32x128xf32, #tpu.memory_space<vmem>>, %arg3: memref<1x128xf32, #tpu.memory_space<vmem>>, %arg4: memref<8x128xf32, #tpu.memory_space<vmem>>, %arg5: memref<8x1xf32, #tpu.memory_space<vmem>>, %arg6: memref<8x16xf32, #tpu.memory_space<vmem>>) attributes {dimension_semantics = [#tpu.dimension_semantics<parallel>], iteration_bounds = array<i64: 1>, scalar_prefetch = 0 : i64, scratch_operands = 0 : i64, tpu.core_type = #tpu.core_type<tc>, window_params = [{transform_indices = @transform_0, window_bounds = array<i64: 16, 32>}, {pipeline_mode = #tpu.pipeline_mode<synchronous>, transform_indices = @transform_1, window_bounds = array<i64: 32, 128>}, {pipeline_mode = #tpu.pipeline_mode<synchronous>, transform_indices = @transform_2, window_bounds = array<i64: 1, 128>}, {pipeline_mode = #tpu.pipeline_mode<synchronous>, transform_indices = @transform_3, window_bounds = array<i64: 8, 128>}, {pipeline_mode = #tpu.pipeline_mode<synchronous>, transform_indices = @transform_4, window_bounds = array<i64: 8, 1>}, {transform_indices = @transform_5, window_bounds = array<i64: 8, 16>}]} {
    %c0 = arith.constant 0 : index
    %c0_0 = arith.constant 0 : index
    %0 = vector.load %arg1[%c0, %c0_0] : memref<16x32xf32, #tpu.memory_space<vmem>>, vector<16x32xf32>
    %c0_1 = arith.constant 0 : index
    %c0_2 = arith.constant 0 : index
    %1 = vector.load %arg2[%c0_1, %c0_2] : memref<32x128xf32, #tpu.memory_space<vmem>>, vector<32x128xf32>
    %cst = arith.constant dense<0.000000e+00> : vector<16x128xf32>
    %2 = tpu.matmul %0, %1, %cst {dimension_numbers = #tpu.dot_dimension_numbers<[1], [0], [0], [1], [0, 0, 1, 1], [], []>} : vector<16x32xf32>, vector<32x128xf32>, vector<16x128xf32> -> vector<16x128xf32>
    %c0_3 = arith.constant 0 : index
    %c0_4 = arith.constant 0 : index
    %3 = vector.load %arg3[%c0_3, %c0_4] : memref<1x128xf32, #tpu.memory_space<vmem>>, vector<1x128xf32>
    %4 = vector.broadcast %3 : vector<1x128xf32> to vector<16x128xf32>
    %5 = arith.addf %2, %4 : vector<16x128xf32>
    %6 = math.tanh %5 : vector<16x128xf32>
    %c0_5 = arith.constant 0 : index
    %c0_6 = arith.constant 0 : index
    %7 = vector.load %arg4[%c0_5, %c0_6] : memref<8x128xf32, #tpu.memory_space<vmem>>, vector<8x128xf32>
    %cst_7 = arith.constant dense<0.000000e+00> : vector<8x16xf32>
    %8 = tpu.matmul %7, %6, %cst_7 {dimension_numbers = #tpu.dot_dimension_numbers<[1], [1], [0], [0], [0, 0, 1, 0], [], []>} : vector<8x128xf32>, vector<16x128xf32>, vector<8x16xf32> -> vector<8x16xf32>
    %c0_8 = arith.constant 0 : index
    %c0_9 = arith.constant 0 : index
    %9 = vector.load %arg5[%c0_8, %c0_9] : memref<8x1xf32, #tpu.memory_space<vmem>>, vector<8x1xf32>
    %10 = vector.broadcast %9 : vector<8x1xf32> to vector<8x16xf32>
    %11 = arith.addf %8, %10 : vector<8x16xf32>
    %c0_10 = arith.constant 0 : index
    %c0_11 = arith.constant 0 : index
    %12 = vector.load %arg6[%c0_10, %c0_11] : memref<8x16xf32, #tpu.memory_space<vmem>>, vector<8x16xf32>
    tpu.vector_store %arg6[%c0_10, %c0_11], %11 {strides = array<i32>} : memref<8x16xf32, #tpu.memory_space<vmem>>, vector<8x16xf32>,
    return
  }
  func.func @transform_0(%arg0: i32) -> (i32, i32) {
    %c0_i32 = arith.constant 0 : i32
    %c0_i32_0 = arith.constant 0 : i32
    return %arg0, %c0_i32 : i32, i32
  }
  func.func @transform_1(%arg0: i32) -> (i32, i32) {
    %c0_i32 = arith.constant 0 : i32
    %c0_i32_0 = arith.constant 0 : i32
    %c0_i32_1 = arith.constant 0 : i32
    return %c0_i32, %c0_i32_0 : i32, i32
  }
  func.func @transform_2(%arg0: i32) -> (i32, i32) {
    %c0_i32 = arith.constant 0 : i32
    %c0_i32_0 = arith.constant 0 : i32
    %c0_i32_1 = arith.constant 0 : i32
    return %c0_i32, %c0_i32_0 : i32, i32
  }
  func.func @transform_3(%arg0: i32) -> (i32, i32) {
    %c0_i32 = arith.constant 0 : i32
    %c0_i32_0 = arith.constant 0 : i32
    %c0_i32_1 = arith.constant 0 : i32
    return %c0_i32, %c0_i32_0 : i32, i32
  }
  func.func @transform_4(%arg0: i32) -> (i32, i32) {
    %c0_i32 = arith.constant 0 : i32
    %c0_i32_0 = arith.constant 0 : i32
    %c0_i32_1 = arith.constant 0 : i32
    return %c0_i32, %c0_i32_0 : i32, i32
  }
  func.func @transform_5(%arg0: i32) -> (i32, i32) {
    %c0_i32 = arith.constant 0 : i32
    %c0_i32_0 = arith.constant 0 : i32
    return %c0_i32, %arg0 : i32, i32
  }
}

</mosaic_0001>

<bundles_post_ra>
// kernel: tpu_custom_call.1
= control target key start
LH: loop header
LB: loop body
LE: loop exit
PB: predicated region body
PF: predicated region fallthrough
CT: control target
= control target key end

     0   :  { %10 = vsyncpa [#allocation3], 0  ;;  %s292_s0 = inlined_call_operand.hbm [shape: f32[16,32], index: 0, kind: input, shape index: {}]   ;;  %s293_s1 = inlined_call_operand.hbm [shape: f32[32,128], index: 1, kind: input, shape index: {}]   ;;  %s294_s2 = inlined_call_operand.vmem [shape: f32[1,128], index: 2, kind: input, shape index: {}]   ;;  %s295_s3 = inlined_call_operand.vmem [shape: f32[8,128], index: 3, kind: input, shape index: {}]   ;;  %s296_s4 = inlined_call_operand.vmem [shape: f32[8,1], index: 4, kind: input, shape index: {}]   ;;  %s297_s5 = inlined_call_operand.hbm [shape: f32[8,16], index: 5, kind: output, shape index: {}]  }
   0x1   :  { %11 = vsyncpa [#allocation6], 0 }
   0x2   :  { %12 = vsyncpa [#allocation4], 0  ;;  %s17_s20 = sshll.u32 %s292_s0, 4  ;;  %s238_s21 = smov [#allocation2]   ;;  %s18_s20 = int_to_ptr.hbm [resolvable:$true] %s17_s20 }
   0x3   :  { %s19_s22 = sshll.u32 %s238_s21, 4  ;;  %s30_s25 = sshll.u32 %s293_s1, 4  ;;  %s20_s22 = int_to_ptr.vmem [resolvable:$true] %s19_s22  ;;  %s31_s25 = int_to_ptr.hbm [resolvable:$true] %s30_s25 }
   0x4   :  { %s239_s26 = smov 128   ;;  %s240_s27 = smov 8  }
   0x5   :  { %25 = dma.hbm_to_vmem [thread:$0]  %s18_s20, 256, %s20_s22, [#allocation3], %s239_s26, %s239_s26, %s240_s27  }
   0x6   :  { %s241_s28 = smov [#allocation5]  }
   0x7   :  { %s32_s29 = sshll.u32 %s241_s28, 4  ;;  %s33_s29 = int_to_ptr.vmem [resolvable:$true] %s32_s29 }
   0x8   :  { %38 = dma.hbm_to_vmem [thread:$0]  %s31_s25, 512, %s33_s29, [#allocation6], %s239_s26, %s239_s26, %s240_s27  }
   0x9   :  { %232 = dma.done.wait [#allocation3], 256  }
   0xa   :  { %233 = vsyncadd [#allocation3], 4294967040 }
   0xb   :  { %234 = dma.done.wait [#allocation6], 512  }
   0xc   :  { %235 = vsyncadd [#allocation6], 4294966784  ;;  %v58_v0 = vld [vmem:[#allocation5 + $0x18] sm:$0xff]  ;;  %v57_v1 = vld [vmem:[#allocation5 + $0x10] sm:$0xff]  ;;  %vm63_vm0 = vcmask 261120   ;;  %v242_v7 = vmov 0  }
   0xd   :  { %144 = vmatpush.msra.mxu2 %v58_v0  ;;  %82 = vmatpush.msra.mxu0 %v58_v0  ;;  %v56_v2 = vld [vmem:[#allocation5 + $0x8] sm:$0xff]  ;;  %v55_v3 = vld [vmem:[#allocation5] sm:$0xff]  ;;  %v54_v4 = vld [vmem:[#allocation2 + $0x8] sm:$0xff]  ;;  %s131_s11 = sshll.u32 %s297_s5, 4  ;;  %vm122_vm1 = vcmask 130048   ;;  %s132_s11 = int_to_ptr.hbm [resolvable:$true] %s131_s11 }
   0xe   :  { %v53_v5 = vld [vmem:[#allocation2] sm:$0xff]  ;;  %154 = vset.pattern.permute.xlu0 %v242_v7 }
   0xf   :  { %145 = vmatpush.msra.mxu2 %v57_v1  ;;  %83 = vmatpush.msra.mxu0 %v57_v1  ;;  %v96_v6 = vld [vmem:[%s296_s4] sm:$0xff]  ;;  %s243_s4 = smov [#allocation7]  }
  0x10   :  { %99 = vperm.xlu0 %154, %v96_v6   ;;  %v155_v8 = vld [vmem:[%s294_s2] ss:$0 sm:$0xff]  ;;  %s129_s9 = sshll.u32 %s243_s4, 4  ;;  %s130_s9 = int_to_ptr.vmem [resolvable:$true] %s129_s9 }
  0x11   :  { %146 = vmatpush.msra.mxu2 %v56_v2  ;;  %84 = vmatpush.msra.mxu0 %v56_v2  ;;  %v95_v15 = vld [vmem:[%s295_s3] sm:$0xff] }
  0x13   :  { %147 = vmatpush.msra.mxu2 %v55_v3  ;;  %85 = vmatpush.msra.mxu0 %v55_v3 }
  0x14   :  { %143 = vmatmul.msk.f32.vlgmr.msra.gmra.mxu2 %vm63_vm0, %v54_v4  ;;  %142 = vmatmul.msk.f32.vlgmr.msra.gmra.mxu0 %vm63_vm0, %v53_v5 }
  0x82   :  { %v100_v16 = vpop.permute.xlu0 %99 }
  0x91   :  { %v87_v9 = vpop.f32.mrf.mxu0 }
  0x92   :  { %v88_v12 = vadd.f32 %v155_v8, %v87_v9 }
  0x97   :  { %v90_v10 = vpop.f32.mrf.mxu2 }
  0x98   :  { %v91_v11 = vadd.f32 %v155_v8, %v90_v10 }
  0x9a   :  { %156 = vtanh.f32 %v91_v11 }
  0x9b   :  { %158 = vtanh.f32 %v88_v12 }
  0xa0   :  { %v157_v13 = vpop.eup %156 }
  0xa1   :  { %116 = vmatpush.xpose.msra.mxu1 %v157_v13  ;;  %v159_v14 = vpop.eup %158 }
  0xa5   :  { %117 = vmatpush.xpose.msra.mxu1 %v159_v14 }
  0xa8   :  { %118 = vmatmul.f32.vlgmr.msra.gmra.mxu1 %v95_v15 }
 0x125   :  { %v119_v17 = vpop.f32.mrf.mxu1 }
 0x126   :  { %v120_v18 = vadd.f32 %v119_v17, %v100_v16 }
 0x128   :  { %123 = vst.msk [vmem:[#allocation7] sm:$0xff] %vm122_vm1, %v120_v18 }
 0x129   :  { %134 = dma.vmem_to_hbm [thread:$0]  %s130_s9, 128, %s132_s11, [#allocation4]  }
 0x12a   :  { %236 = dma.done.wait [#allocation4], 128  }
 0x12b   :  { %237 = vsyncadd [#allocation4], 4294967168 }
 0x12c   :  { %139 = vsyncpa [#allocation3], 1 }
 0x12d   :  { %140 = vsyncpa [#allocation6], 1 }
 0x12e   :  { %141 = vsyncpa [#allocation4], 1 }

</bundles_post_ra>
